<compile_context>
chip_gen: v6e
topology: v6e:2x2x1
jax: 0.10.0
libtpu: 0.0.40
codegen_flags: <defaults>
</compile_context>

<pallas_src>
import math
import functools

import jax
import jax.numpy as jnp
from jax import lax
from jax.experimental import pallas as pl
from jax.experimental.pallas import tpu as pltpu


def _arcface_kernel(x_ref, wt_ref, lbl_ref, loss_ref, *,
                    s, cos_m, sin_m, th, mm, easy_margin, num_classes):
    x = x_ref[...]          # (B, D)   float32
    wt = wt_ref[...]        # (D, Cp)  float32  (weight^T, class dim zero-padded)
    lbl = lbl_ref[...]      # (B, 1)   int32

    B = x.shape[0]
    Cp = wt.shape[1]
    eps2 = 1e-24            # clamp on sum-of-squares (== eps^2 with eps=1e-12)

    # Raw contraction first; normalize the small (B, Cp) output instead of the
    # full weight:  cosine = (x @ w^T) / (|x| * |w|).
    raw = jnp.dot(x, wt, preferred_element_type=jnp.float32)            # (B, Cp)
    row_inv = lax.rsqrt(jnp.maximum(jnp.sum(x * x, axis=1, keepdims=True), eps2))   # (B, 1)
    col_inv = lax.rsqrt(jnp.maximum(jnp.sum(wt * wt, axis=0, keepdims=True), eps2))  # (1, Cp)
    cosine = raw * row_inv * col_inv                                    # (B, Cp)
    # Padded (all-zero) weight columns: raw == 0 exactly -> cosine == 0 exactly.

    col_ids = lax.broadcasted_iota(jnp.int32, (B, Cp), 1)
    is_label = col_ids == lbl                                           # (B, Cp) bool
    valid = col_ids < num_classes                                       # (B, Cp) bool

    # Margin transform only at the label column ((B,1) work instead of (B,Cp)).
    cos_t = jnp.max(jnp.where(is_label, cosine, -2.0), axis=1, keepdims=True)  # (B, 1)
    sin_t = jnp.sqrt(jnp.maximum(1.0 - cos_t * cos_t, 0.0))
    phi_t = cos_t * cos_m - sin_t * sin_m
    if easy_margin:
        phi_t = jnp.where(cos_t > 0.0, phi_t, cos_t)
    else:
        phi_t = jnp.where(cos_t - th > 0.0, phi_t, cos_t - mm)

    # logits: s*phi at the label column, s*cosine elsewhere, -1e30 at padded
    # class columns (excluded from the softmax).  Single fused select chain,
    # no one_hot temporary.
    logits = jnp.where(is_label, s * phi_t,
                       jnp.where(valid, s * cosine, -1e30))             # (B, Cp)

    # cross_entropy(logits, label), mean reduction.  Target logit is s*phi_t.
    m_row = jnp.max(logits, axis=1, keepdims=True)
    lse = m_row + jnp.log(jnp.sum(jnp.exp(logits - m_row), axis=1, keepdims=True))
    per_sample = lse - s * phi_t                                        # (B, 1)
    loss_ref[0, 0] = jnp.sum(per_sample) * (1.0 / B)


def prepare_arcface_weight(weight):
    """One-time init: zero-pad the class dim to a lane multiple and transpose.

    Returns the canonical (D, Cp) parameter consumed by arcface_forward, so the
    per-call path has no pad/transpose XLA ops.
    """
    C, D = weight.shape
    Cp = ((C + 127) // 128) * 128
    return jnp.pad(weight, ((0, Cp - C), (0, 0))).T                     # (D, Cp)


def prepare_label(label):
    """One-time per-batch prep: (B,) labels -> (B, 1) int32 column."""
    return label.reshape(-1, 1).astype(jnp.int32)


def arcface_forward(x, w_t, label2d, *, num_classes,
                    s=32.0, m=0.5, easy_margin=False):
    """Training-mode ArcFace forward: returns the scalar cross-entropy loss.

    x:        (B, D)  float32
    w_t:      (D, Cp) float32   -- from prepare_arcface_weight
    label2d:  (B, 1)  int32     -- from prepare_label
    """
    kernel = functools.partial(
        _arcface_kernel,
        s=float(s),
        cos_m=math.cos(m),
        sin_m=math.sin(m),
        th=math.cos(math.pi - m),
        mm=math.sin(math.pi - m) * m,
        easy_margin=easy_margin,
        num_classes=num_classes,
    )

    out = pl.pallas_call(
        kernel,
        out_shape=jax.ShapeDtypeStruct((1, 1), jnp.float32),
        in_specs=[
            pl.BlockSpec(memory_space=pltpu.MemorySpace.VMEM),      # x      (B, D)
            pl.BlockSpec(memory_space=pltpu.MemorySpace.VMEM),      # w^T    (D, Cp)
            pl.BlockSpec(memory_space=pltpu.MemorySpace.VMEM),      # label  (B, 1)
        ],
        out_specs=pl.BlockSpec(memory_space=pltpu.MemorySpace.SMEM),
    )(x, w_t, label2d)
    return out[0, 0]


def _reference(x, weight, label, *, s=32.0, m=0.5, easy_margin=False):
    cos_m, sin_m = math.cos(m), math.sin(m)
    th, mm = math.cos(math.pi - m), math.sin(math.pi - m) * m
    xn = x / jnp.maximum(jnp.linalg.norm(x, axis=1, keepdims=True), 1e-12)
    wn = weight / jnp.maximum(jnp.linalg.norm(weight, axis=1, keepdims=True), 1e-12)
    cosine = xn @ wn.T
    sine = jnp.sqrt(jnp.maximum(1.0 - cosine ** 2, 0.0))
    phi = cosine * cos_m - sine * sin_m
    if easy_margin:
        phi = jnp.where(cosine > 0.0, phi, cosine)
    else:
        phi = jnp.where(cosine - th > 0.0, phi, cosine - mm)
    one_hot = jax.nn.one_hot(label, weight.shape[0], dtype=jnp.float32)
    logits = (one_hot * phi + (1.0 - one_hot) * cosine) * s
    logp = jax.nn.log_softmax(logits, axis=1)
    return -jnp.mean(jnp.sum(one_hot * logp, axis=1))


if __name__ == "__main__":
    in_features, out_features = 128, 200   # module defaults
    B = 8

    key = jax.random.PRNGKey(0)
    kx, kl, kw = jax.random.split(key, 3)

    x = jax.random.normal(kx, (B, in_features), dtype=jnp.float32)
    label = jax.random.randint(kl, (B,), 0, out_features, dtype=jnp.int32)

    # nn.init.xavier_uniform_ on (out_features, in_features)
    bound = math.sqrt(6.0 / (in_features + out_features))
    weight = jax.random.uniform(kw, (out_features, in_features),
                                minval=-bound, maxval=bound, dtype=jnp.float32)

    # One-time parameter / batch prep (outside the per-call hot path).
    w_t = prepare_arcface_weight(weight)       # (D, Cp) canonical parameter
    label2d = prepare_label(label)             # (B, 1) int32

    loss = arcface_forward(x, w_t, label2d, num_classes=out_features)
    jax.block_until_ready(loss)

    ref = _reference(x, weight, label)
    assert jnp.allclose(loss, ref, rtol=1e-4, atol=1e-4), (loss, ref)

    print("KERNEL_OK")
</pallas_src>

<mosaic_0001>
module attributes {stable_mosaic.version = 11 : i64} {
  func.func @_arcface_kernel(%arg0: memref<8x128xf32, #tpu.memory_space<vmem>>, %arg1: memref<128x256xf32, #tpu.memory_space<vmem>>, %arg2: memref<8x1xi32, #tpu.memory_space<vmem>>, %arg3: memref<1x1xf32, #tpu.memory_space<smem>>) attributes {dimension_semantics = [], scalar_prefetch = 0 : i64, scratch_operands = 0 : i64, tpu.core_type = #tpu.core_type<tc>} {
    %c0 = arith.constant 0 : index
    %c0_0 = arith.constant 0 : index
    %0 = vector.load %arg0[%c0, %c0_0] : memref<8x128xf32, #tpu.memory_space<vmem>>, vector<8x128xf32>
    %c0_1 = arith.constant 0 : index
    %c0_2 = arith.constant 0 : index
    %1 = vector.load %arg1[%c0_1, %c0_2] : memref<128x256xf32, #tpu.memory_space<vmem>>, vector<128x256xf32>
    %c0_3 = arith.constant 0 : index
    %c0_4 = arith.constant 0 : index
    %2 = vector.load %arg2[%c0_3, %c0_4] : memref<8x1xi32, #tpu.memory_space<vmem>>, vector<8x1xi32>
    %cst = arith.constant dense<0.000000e+00> : vector<8x256xf32>
    %3 = tpu.matmul %0, %1, %cst {dimension_numbers = #tpu.dot_dimension_numbers<[1], [0], [0], [1], [0, 0, 1, 1], [], []>} : vector<8x128xf32>, vector<128x256xf32>, vector<8x256xf32> -> vector<8x256xf32>
    %4 = arith.mulf %0, %0 : vector<8x128xf32>
    %cst_5 = arith.constant dense<0.000000e+00> : vector<8xf32>
    %5 = vector.multi_reduction <add>, %4, %cst_5 [1] : vector<8x128xf32> to vector<8xf32>
    %6 = vector.shape_cast %5 : vector<8xf32> to vector<8x1xf32>
    %cst_6 = arith.constant 1.000000e-24 : f32
    %7 = vector.broadcast %cst_6 : f32 to vector<8x1xf32>
    %8 = arith.maximumf %6, %7 : vector<8x1xf32>
    %9 = math.rsqrt %8 : vector<8x1xf32>
    %10 = arith.mulf %1, %1 : vector<128x256xf32>
    %cst_7 = arith.constant dense<0.000000e+00> : vector<256xf32>
    %11 = vector.multi_reduction <add>, %10, %cst_7 [0] : vector<128x256xf32> to vector<256xf32>
    %12 = vector.shape_cast %11 : vector<256xf32> to vector<1x256xf32>
    %cst_8 = arith.constant 1.000000e-24 : f32
    %13 = vector.broadcast %cst_8 : f32 to vector<1x256xf32>
    %14 = arith.maximumf %12, %13 : vector<1x256xf32>
    %15 = math.rsqrt %14 : vector<1x256xf32>
    %16 = vector.broadcast %9 : vector<8x1xf32> to vector<8x256xf32>
    %17 = arith.mulf %3, %16 : vector<8x256xf32>
    %18 = vector.broadcast %15 : vector<1x256xf32> to vector<8x256xf32>
    %19 = arith.mulf %17, %18 : vector<8x256xf32>
    %20 = tpu.iota {dimensions = array<i32: 1>} : vector<8x256xi32>
    %21 = vector.broadcast %2 : vector<8x1xi32> to vector<8x256xi32>
    %22 = arith.cmpi eq, %20, %21 : vector<8x256xi32>
    %c200_i32 = arith.constant 200 : i32
    %23 = vector.broadcast %c200_i32 : i32 to vector<8x256xi32>
    %24 = arith.cmpi slt, %20, %23 : vector<8x256xi32>
    %cst_9 = arith.constant -2.000000e+00 : f32
    %25 = vector.broadcast %cst_9 : f32 to vector<8x256xf32>
    %26 = arith.select %22, %19, %25 : vector<8x256xi1>, vector<8x256xf32>
    %cst_10 = arith.constant dense<0xFF800000> : vector<8xf32>
    %27 = vector.multi_reduction <maximumf>, %26, %cst_10 [1] : vector<8x256xf32> to vector<8xf32>
    %28 = vector.shape_cast %27 : vector<8xf32> to vector<8x1xf32>
    %29 = arith.mulf %28, %28 : vector<8x1xf32>
    %cst_11 = arith.constant 1.000000e+00 : f32
    %30 = vector.broadcast %cst_11 : f32 to vector<8x1xf32>
    %31 = arith.subf %30, %29 : vector<8x1xf32>
    %cst_12 = arith.constant 0.000000e+00 : f32
    %32 = vector.broadcast %cst_12 : f32 to vector<8x1xf32>
    %33 = arith.maximumf %31, %32 : vector<8x1xf32>
    %34 = math.sqrt %33 : vector<8x1xf32>
    %cst_13 = arith.constant 0.87758255 : f32
    %35 = vector.broadcast %cst_13 : f32 to vector<8x1xf32>
    %36 = arith.mulf %28, %35 : vector<8x1xf32>
    %cst_14 = arith.constant 0.47942555 : f32
    %37 = vector.broadcast %cst_14 : f32 to vector<8x1xf32>
    %38 = arith.mulf %34, %37 : vector<8x1xf32>
    %39 = arith.subf %36, %38 : vector<8x1xf32>
    %cst_15 = arith.constant -0.87758255 : f32
    %40 = vector.broadcast %cst_15 : f32 to vector<8x1xf32>
    %41 = arith.subf %28, %40 : vector<8x1xf32>
    %cst_16 = arith.constant 0.000000e+00 : f32
    %42 = vector.broadcast %cst_16 : f32 to vector<8x1xf32>
    %43 = arith.cmpf ogt, %41, %42 : vector<8x1xf32>
    %cst_17 = arith.constant 0.239712775 : f32
    %44 = vector.broadcast %cst_17 : f32 to vector<8x1xf32>
    %45 = arith.subf %28, %44 : vector<8x1xf32>
    %46 = arith.select %43, %39, %45 : vector<8x1xi1>, vector<8x1xf32>
    %cst_18 = arith.constant 3.200000e+01 : f32
    %47 = vector.broadcast %cst_18 : f32 to vector<8x1xf32>
    %48 = arith.mulf %47, %46 : vector<8x1xf32>
    %cst_19 = arith.constant 3.200000e+01 : f32
    %49 = vector.broadcast %cst_19 : f32 to vector<8x256xf32>
    %50 = arith.mulf %49, %19 : vector<8x256xf32>
    %cst_20 = arith.constant -1.000000e+30 : f32
    %51 = vector.broadcast %cst_20 : f32 to vector<8x256xf32>
    %52 = arith.select %24, %50, %51 : vector<8x256xi1>, vector<8x256xf32>
    %53 = vector.shape_cast %48 : vector<8x1xf32> to vector<8x1xf32>
    %54 = vector.broadcast %53 : vector<8x1xf32> to vector<8x256xf32>
    %55 = arith.select %22, %54, %52 : vector<8x256xi1>, vector<8x256xf32>
    %cst_21 = arith.constant dense<0xFF800000> : vector<8xf32>
    %56 = vector.multi_reduction <maximumf>, %55, %cst_21 [1] : vector<8x256xf32> to vector<8xf32>
    %57 = vector.shape_cast %56 : vector<8xf32> to vector<8x1xf32>
    %58 = vector.broadcast %57 : vector<8x1xf32> to vector<8x256xf32>
    %59 = arith.subf %55, %58 : vector<8x256xf32>
    %60 = math.exp %59 : vector<8x256xf32>
    %cst_22 = arith.constant dense<0.000000e+00> : vector<8xf32>
    %61 = vector.multi_reduction <add>, %60, %cst_22 [1] : vector<8x256xf32> to vector<8xf32>
    %62 = vector.shape_cast %61 : vector<8xf32> to vector<8x1xf32>
    %63 = math.log %62 : vector<8x1xf32>
    %64 = arith.addf %57, %63 : vector<8x1xf32>
    %cst_23 = arith.constant 3.200000e+01 : f32
    %65 = vector.broadcast %cst_23 : f32 to vector<8x1xf32>
    %66 = arith.mulf %65, %46 : vector<8x1xf32>
    %67 = arith.subf %64, %66 : vector<8x1xf32>
    %68 = vector.shape_cast %67 : vector<8x1xf32> to vector<1x8x1xf32>
    %cst_24 = arith.constant dense<0.000000e+00> : vector<1xf32>
    %69 = vector.multi_reduction <add>, %68, %cst_24 [1, 2] : vector<1x8x1xf32> to vector<1xf32>
    %70 = vector.shape_cast %69 : vector<1xf32> to vector<1x1x1xf32>
    %71 = vector.extract %70[0, 0, 0] : f32 from vector<1x1x1xf32>
    %cst_25 = arith.constant 1.250000e-01 : f32
    %72 = arith.mulf %71, %cst_25 : f32
    %c0_26 = arith.constant 0 : index
    %c0_27 = arith.constant 0 : index
    %73 = memref.load %arg3[%c0_26, %c0_27] : memref<1x1xf32, #tpu.memory_space<smem>>
    memref.store %72, %arg3[%c0_26, %c0_27] : memref<1x1xf32, #tpu.memory_space<smem>>
    return
  }
}

</mosaic_0001>

<bundles_post_ra>
// kernel: tpu_custom_call.1
= control target key start
LH: loop header
LB: loop body
LE: loop exit
PB: predicated region body
PF: predicated region fallthrough
CT: control target
= control target key end

     0   :  { %8 = vsyncpa [#allocation3], 0  ;;  %s503_s0 = inlined_call_operand.vmem [shape: f32[8,128], index: 0, kind: input, shape index: {}]   ;;  %s504_s1 = inlined_call_operand.hbm [shape: f32[128,256], index: 1, kind: input, shape index: {}]   ;;  %s505_s2 = inlined_call_operand.vmem [shape: s32[8,1], index: 2, kind: input, shape index: {}]   ;;  %s506_s3 = inlined_call_operand.hbm [shape: f32[1,1], index: 3, kind: output, shape index: {}]  }
   0x1   :  { %9 = vsyncpa [#allocation4], 0  ;;  %s361_s12 = smov [#allocation2]  }
   0x2   :  { %s17_s13 = sshll.u32 %s361_s12, 4  ;;  %s18_s13 = int_to_ptr.vmem [resolvable:$true] %s17_s13 }
   0x3   :  { %s337_s14 = scalar_lea.vmem %s18_s13, 4096  ;;  %p342_p1 = scmp.lt.s32.totalorder %s18_s13, %s18_s13 }
   0x4   :  { %p338_p0 = scmp.ne.s32.totalorder %s18_s13, %s337_s14  ;;  %p343_p2 = scmp.lt.s32.totalorder %s337_s14, %s337_s14 }
   0x6   :  { %p344_p3 = por %p343_p2, %p342_p1 }
   0x8   :  { %p345_p4 = pnand %p344_p3, %p338_p0 }
   0xa   :  { %348 = shalt.err (!%p345_p4)
}
   0xb   :  { %s362_s15 = smov 256   ;;  %s363_s16 = smov 16  }
   0xc   :  { %23 = dma.hbm_to_vmem [thread:$0]  %s504_s1, 4096, %s18_s13, [#allocation3], %s362_s15, %s362_s15, %s363_s16  }
   0xd   :  { %357 = dma.done.wait [#allocation3], 4096  }
   0xe   :  { %358 = vsyncadd [#allocation3], 4294963200  ;;  %v364_v0 = vmov 0.0   ;;  %v365_v1 = vmov 0   ;;  %v390_v2 = vld [vmem:[#allocation2 + $0xf8] sm:$0xff]  ;;  %v392_v3 = vld [vmem:[#allocation2 + $0xf0] sm:$0xff] }
   0xf   :  { %127 = vmatprep.mubr.f32.mxu0 %v364_v0  ;;  %314 = vset.pattern.permute.xlu0 %v365_v1  ;;  %v394_v4 = vld [vmem:[#allocation2 + $0xe8] sm:$0xff]  ;;  %v397_v5 = vld [vmem:[#allocation2 + $0xe0] sm:$0xff]  ;;  %v400_v6 = vld [vmem:[#allocation2 + $0xd8] sm:$0xff]  ;;  %vm276_vm6 = vcmask 7168   ;;  %s366_s22 = smov [#allocation5]  }
  0x10   :  { %63 = vmatprep.subr.mxu0 %v390_v2  ;;  %v403_v7 = vld [vmem:[#allocation2 + $0xd0] sm:$0xff]  ;;  %v406_v8 = vld [vmem:[#allocation2 + $0xc8] sm:$0xff]  ;;  %v409_v9 = vld [vmem:[#allocation2 + $0xc0] sm:$0xff] }
  0x11   :  { %64 = vmatpush1.msra.mxu0 %v392_v3  ;;  %v412_v10 = vld [vmem:[#allocation2 + $0xb8] sm:$0xff]  ;;  %v415_v11 = vld [vmem:[#allocation2 + $0xb0] sm:$0xff]  ;;  %v417_v12 = vld [vmem:[#allocation2 + $0xa8] sm:$0xff] }
  0x12   :  { %65 = vmatprep.subr.mxu0 %v394_v4  ;;  %v420_v13 = vld [vmem:[#allocation2 + $0xa0] sm:$0xff]  ;;  %v422_v14 = vld [vmem:[#allocation2 + $0x98] sm:$0xff]  ;;  %v424_v15 = vld [vmem:[#allocation2 + $0x28] sm:$0xff] }
  0x13   :  { %66 = vmatpush1.msra.mxu0 %v397_v5  ;;  %v427_v16 = vld [vmem:[#allocation2 + $0x20] sm:$0xff]  ;;  %v429_v17 = vld [vmem:[#allocation2 + $0x18] sm:$0xff]  ;;  %v431_v18 = vld [vmem:[#allocation2 + $0x10] sm:$0xff]  ;;  %v144_v19 = vmul.f32 %v424_v15, %v424_v15 }
  0x14   :  { %67 = vmatprep.subr.mxu0 %v400_v6  ;;  %v142_v20 = vmul.f32 %v429_v17, %v429_v17  ;;  %v141_v21 = vmul.f32 %v431_v18, %v431_v18  ;;  %v440_v22 = vld [vmem:[#allocation2 + $0x8] sm:$0xff]  ;;  %v442_v23 = vld [vmem:[#allocation2] sm:$0xff]  ;;  %v48_v25 = vld [vmem:[#allocation2 + $0x90] sm:$0xff]  ;;  %v143_v27 = vmul.f32 %v427_v16, %v427_v16 }
  0x15   :  { %68 = vmatpush1.msra.mxu0 %v403_v7  ;;  %v447_v24 = vld [vmem:[%s503_s0] sm:$0xff]  ;;  %v37_v26 = vld [vmem:[#allocation2 + $0x38] sm:$0xff]  ;;  %v140_v28 = vmul.f32 %v440_v22, %v440_v22  ;;  %v139_v29 = vmul.f32 %v442_v23, %v442_v23  ;;  %v47_v31 = vld [vmem:[#allocation2 + $0x88] sm:$0xff] }
  0x16   :  { %69 = vmatprep.subr.mxu0 %v406_v8  ;;  %v134_v30 = vmul.f32 %v447_v24, %v447_v24  ;;  %v146_v32 = vmul.f32 %v37_v26, %v37_v26  ;;  %v36_v33 = vld [vmem:[#allocation2 + $0x30] sm:$0xff]  ;;  %v46_v34 = vld [vmem:[#allocation2 + $0x80] sm:$0xff]  ;;  %v45_v38 = vld [vmem:[#allocation2 + $0x78] sm:$0xff]  ;;  %v156_v62 = vmul.f32 %v47_v31, %v47_v31 }
  0x17   :  { %70 = vmatpush1.msra.mxu0 %v409_v9  ;;  %v145_v35 = vmul.f32 %v36_v33, %v36_v33  ;;  %v192_v36 = vadd.f32 %v142_v20, %v140_v28  ;;  %v171_v37 = vadd.f32 %v141_v21, %v139_v29  ;;  %v39_v39 = vld [vmem:[#allocation2 + $0x48] sm:$0xff]  ;;  %v38_v40 = vld [vmem:[#allocation2 + $0x40] sm:$0xff]  ;;  %v44_v41 = vld [vmem:[#allocation2 + $0x70] sm:$0xff]  ;;  %v154_v58 = vmul.f32 %v45_v38, %v45_v38 }
  0x18   :  { %71 = vmatprep.subr.mxu0 %v412_v10  ;;  %135 = vadd.xlane.f32.xlu0 %v134_v30  ;;  %v148_v42 = vmul.f32 %v39_v39, %v39_v39  ;;  %v147_v43 = vmul.f32 %v38_v40, %v38_v40  ;;  %v43_v46 = vld [vmem:[#allocation2 + $0x68] sm:$0xff]  ;;  %v41_v47 = vld [vmem:[#allocation2 + $0x58] sm:$0xff]  ;;  %v40_v48 = vld [vmem:[#allocation2 + $0x50] sm:$0xff]  ;;  %v153_v59 = vmul.f32 %v44_v41, %v44_v41 }
  0x19   :  { %72 = vmatpush1.msra.mxu0 %v415_v11  ;;  %v193_v44 = vadd.f32 %v192_v36, %v144_v19  ;;  %v172_v45 = vadd.f32 %v171_v37, %v143_v27  ;;  %v42_v49 = vld [vmem:[#allocation2 + $0x60] sm:$0xff]  ;;  %v150_v50 = vmul.f32 %v41_v47, %v41_v47  ;;  %v149_v51 = vmul.f32 %v40_v48, %v40_v48 }
  0x1a   :  { %73 = vmatprep.subr.mxu0 %v417_v12  ;;  %v152_v54 = vmul.f32 %v43_v46, %v43_v46  ;;  %v151_v55 = vmul.f32 %v42_v49, %v42_v49  ;;  %v155_v63 = vmul.f32 %v46_v34, %v46_v34  ;;  %v158_v19 = vmul.f32 %v422_v14, %v422_v14 }
  0x1b   :  { %74 = vmatpush1.msra.mxu0 %v420_v13  ;;  %v194_v52 = vadd.f32 %v193_v44, %v146_v32  ;;  %v173_v53 = vadd.f32 %v172_v45, %v145_v35  ;;  %v157_v20 = vmul.f32 %v48_v25, %v48_v25  ;;  %v160_v28 = vmul.f32 %v417_v12, %v417_v12 }
  0x1c   :  { %75 = vmatprep.subr.mxu0 %v422_v14  ;;  %v159_v29 = vmul.f32 %v420_v13, %v420_v13  ;;  %v162_v14 = vmul.f32 %v412_v10, %v412_v10  ;;  %v164_v12 = vmul.f32 %v406_v8, %v406_v8  ;;  %v163_v13 = vmul.f32 %v409_v9, %v409_v9  ;;  %v62_v10 = vld [vmem:[%s505_s2] sm:$0xff] }
  0x1d   :  { %76 = vmatpush1.msra.mxu0 %v48_v25  ;;  %v195_v56 = vadd.f32 %v194_v52, %v148_v42  ;;  %v174_v57 = vadd.f32 %v173_v53, %v147_v43  ;;  %v161_v25 = vmul.f32 %v415_v11, %v415_v11  ;;  %v165_v8 = vmul.f32 %v403_v7, %v403_v7 }
  0x1e   :  { %77 = vmatprep.subr.mxu0 %v47_v31  ;;  %v167_v9 = vmul.f32 %v397_v5, %v397_v5 }
  0x1f   :  { %78 = vmatpush1.msra.mxu0 %v46_v34  ;;  %v196_v60 = vadd.f32 %v195_v56, %v150_v50  ;;  %v175_v61 = vadd.f32 %v174_v57, %v149_v51  ;;  %v168_v34 = vmul.f32 %v394_v4, %v394_v4  ;;  %v221_v51 = vlaneseq }
  0x20   :  { %79 = vmatprep.subr.mxu0 %v45_v38 }
  0x21   :  { %80 = vmatpush1.msra.mxu0 %v44_v41  ;;  %v197_v0 = vadd.f32 %v196_v60, %v152_v54  ;;  %v176_v1 = vadd.f32 %v175_v61, %v151_v55  ;;  %v222_v52 = vand.u32 127, %v221_v51 }
  0x22   :  { %81 = vmatprep.subr.mxu0 %v43_v46 }
  0x23   :  { %82 = vmatpush1.msra.mxu0 %v42_v49  ;;  %v198_v21 = vadd.f32 %v197_v0, %v154_v58  ;;  %v177_v27 = vadd.f32 %v176_v1, %v153_v59  ;;  %v223_v56 = vadd.s32 128, %v222_v52 }
  0x24   :  { %83 = vmatprep.subr.mxu0 %v41_v47 }
  0x25   :  { %84 = vmatpush1.msra.mxu0 %v40_v48  ;;  %v199_v30 = vadd.f32 %v198_v21, %v156_v62  ;;  %v178_v31 = vadd.f32 %v177_v27, %v155_v63  ;;  %vm230_vm2 = vcmp.lt.s32.totalorder %v223_v56, 200 }
  0x26   :  { %85 = vmatprep.subr.mxu0 %v39_v39 }
  0x27   :  { %86 = vmatpush1.msra.mxu0 %v38_v40  ;;  %v179_v32 = vadd.f32 %v178_v31, %v157_v20 }
  0x28   :  { %87 = vmatprep.subr.mxu0 %v37_v26  ;;  %v200_v26 = vadd.f32 %v199_v30, %v158_v19 }
  0x29   :  { %88 = vmatpush1.msra.mxu0 %v36_v33 }
  0x2a   :  { %89 = vmatprep.subr.mxu0 %v424_v15  ;;  %v201_v15 = vadd.f32 %v200_v26, %v160_v28 }
  0x2b   :  { %90 = vmatpush1.msra.mxu0 %v427_v16  ;;  %v180_v16 = vadd.f32 %v179_v32, %v159_v29 }
  0x2c   :  { %91 = vmatprep.subr.mxu0 %v429_v17  ;;  %v202_v11 = vadd.f32 %v201_v15, %v162_v14 }
  0x2d   :  { %92 = vmatpush1.msra.mxu0 %v431_v18  ;;  %v181_v17 = vadd.f32 %v180_v16, %v161_v25 }
  0x2e   :  { %93 = vmatprep.subr.mxu0 %v440_v22  ;;  %v203_v18 = vadd.f32 %v202_v11, %v164_v12  ;;  %225 = vperm.xlu0 %314, %v62_v10   ;;  %v166_v22 = vmul.f32 %v400_v6, %v400_v6 }
  0x2f   :  { %94 = vmatpush1.msra.mxu0 %v442_v23  ;;  %v182_v33 = vadd.f32 %v181_v17, %v163_v13  ;;  %v169_v23 = vmul.f32 %v392_v3, %v392_v3 }
  0x30   :  { %128 = vmatmul.mubr.f32.vlgmr.msra.gmra.mxu0 %v447_v24  ;;  %v170_v24 = vmul.f32 %v390_v2, %v390_v2  ;;  %v204_v37 = vadd.f32 %v203_v18, %v166_v22 }
  0x31   :  { %v183_v35 = vadd.f32 %v182_v33, %v165_v8 }
  0x32   :  { %v205_v7 = vadd.f32 %v204_v37, %v168_v34 }
  0x33   :  { %v184_v36 = vadd.f32 %v183_v35, %v167_v9 }
  0x34   :  { %v206_v39 = vadd.f32 %v205_v7, %v170_v24 }
  0x35   :  { %v185_v38 = vadd.f32 %v184_v36, %v169_v23 }
  0x36   :  { %v207_v5 = vrot.slane %v206_v39, 4 }
  0x37   :  { %v186_v40 = vrot.slane %v185_v38, 4 }
  0x38   :  { %v208_v42 = vadd.f32 %v207_v5, %v206_v39 }
  0x39   :  { %v187_v41 = vadd.f32 %v186_v40, %v185_v38 }
  0x3a   :  { %v209_v43 = vrot.slane %v208_v42, 2 }
  0x3b   :  { %v188_v6 = vrot.slane %v187_v41, 2 }
  0x3c   :  { %v210_v3 = vadd.f32 %v209_v43, %v208_v42 }
  0x3d   :  { %v189_v44 = vadd.f32 %v188_v6, %v187_v41 }
  0x3e   :  { %v211_v46 = vrot.slane %v210_v3, 1 }
  0x3f   :  { %v190_v45 = vrot.slane %v189_v44, 1 }
  0x40   :  { %v212_v49 = vadd.f32 %v211_v46, %v210_v3 }
  0x41   :  { %v191_v47 = vadd.f32 %v190_v45, %v189_v44 }
  0x42   :  { %v214_v50 = vmax.f32 %v212_v49, 1e-24 }
  0x43   :  { %v213_v2 = vmax.f32 %v191_v47, 1e-24 }
  0xa1   :  { %v136_v4 = vpop.xlane.xlu0 %135 }
  0xa2   :  { %v137_v48 = vmax.f32 %v136_v4, 1e-24 }
  0xa4   :  { %315 = vrsqrt.f32 %v137_v48 }
  0xa5   :  { %317 = vrsqrt.f32 %v213_v2 }
  0xa6   :  { %319 = vrsqrt.f32 %v214_v50 }
  0xa9   :  { %v226_v58 = vpop.permute.xlu0 %225 }
  0xaa   :  { %vm227_vm0 = vcmp.eq.s32.totalorder %v222_v52, %v226_v58  ;;  %vm228_vm1 = vcmp.eq.s32.totalorder %v223_v56, %v226_v58 }
  0xb1   :  { %v316_v53 = vpop.eup %315 }
  0xb2   :  { %v318_v54 = vpop.eup %317 }
  0xb3   :  { %v320_v59 = vpop.eup %319 }
  0xf0   :  { %v129_v55 = vpop.f32.mrf.mxu0 }
  0xf1   :  { %v217_v57 = vmul.f32 %v316_v53, %v129_v55 }
  0xf2   :  { %v131_v60 = vpop.f32.mrf.mxu0 }
  0xf3   :  { %v219_v61 = vmul.f32 %v318_v54, %v217_v57  ;;  %v218_v62 = vmul.f32 %v316_v53, %v131_v60 }
  0xf5   :  { %v220_v63 = vmul.f32 %v320_v59, %v218_v62  ;;  %v231_v1 = vsel %vm227_vm0, %v219_v61, -2.0  ;;  %v254_v17 = vmul.f32 32.0, %v219_v61 }
  0xf7   :  { %v255_v0 = vmul.f32 32.0, %v220_v63  ;;  %v232_v19 = vsel %vm228_vm1, %v220_v63, -2.0 }
  0xf8   :  { %v233_v20 = vmax.f32 %v231_v1, %v232_v19 }
  0xf9   :  { %v257_v21 = vsel %vm230_vm2, %v255_v0, -1e+30 }
  0xfa   :  { %234 = vmax.xlane.f32.xlu1 %v233_v20 }
 0x183   :  { %v235_v27 = vpop.xlane.xlu1 %234 }
 0x184   :  { %v236_v28 = vmul.f32 %v235_v27, %v235_v27  ;;  %v304_v12 = vadd.f32 0.87758255, %v235_v27  ;;  %v246_v13 = vmul.f32 0.87758255, %v235_v27  ;;  %v305_v10 = vadd.f32 -0.23971277, %v235_v27 }
 0x186   :  { %v237_v29 = vsub.f32 1.0, %v236_v28  ;;  %vm250_vm5 = vcmp.gt.f32.partialorder %v304_v12, 0.0 }
 0x188   :  { %v238_v30 = vmax.f32 %v237_v29, 0.0 }
 0x18a   :  { %321 = vrsqrt.f32 %v238_v30  ;;  %vm241_vm3 = vcmp.eq.f32.partialorder %v238_v30, inf  ;;  %v244_v25 = vand.u32 2147483648, %v238_v30  ;;  %vm243_vm4 = vcmp.eq.f32.partialorder %v238_v30, 0.0 }
 0x197   :  { %v322_v31 = vpop.eup %321 }
 0x198   :  { %v240_v14 = vmul.f32 %v322_v31, %v238_v30 }
 0x19a   :  { %v242_v26 = vsel %vm241_vm3, %v238_v30, %v240_v14 }
 0x19b   :  { %v245_v32 = vsel %vm243_vm4, %v244_v25, %v242_v26 }
 0x19c   :  { %v247_v15 = vmul.f32 0.47942555, %v245_v32 }
 0x19e   :  { %v248_v16 = vsub.f32 %v246_v13, %v247_v15 }
 0x1a0   :  { %v252_v11 = vsel %vm250_vm5, %v248_v16, %v305_v10 }
 0x1a1   :  { %v253_v18 = vmul.f32 32.0, %v252_v11 }
 0x1a3   :  { %v258_v33 = vsel %vm227_vm0, %v253_v18, %v254_v17  ;;  %v259_v8 = vsel %vm228_vm1, %v253_v18, %v257_v21 }
 0x1a4   :  { %v260_v9 = vmax.f32 %v258_v33, %v259_v8 }
 0x1a6   :  { %261 = vmax.xlane.f32.xlu1 %v260_v9 }
 0x22f   :  { %v262_v22 = vpop.xlane.xlu1 %261 }
 0x230   :  { %v263_v23 = vsub.f32 %v258_v33, %v262_v22  ;;  %v264_v34 = vsub.f32 %v259_v8, %v262_v22 }
 0x232   :  { %v265_v35 = vmul.f32 1.442695, %v263_v23  ;;  %v267_v24 = vmul.f32 1.442695, %v264_v34 }
 0x234   :  { %323 = vpow2.f32 %v265_v35 }
 0x235   :  { %325 = vpow2.f32 %v267_v24 }
 0x241   :  { %v324_v36 = vpop.eup %323 }
 0x242   :  { %v326_v37 = vpop.eup %325 }
 0x243   :  { %v269_v38 = vadd.f32 %v326_v37, %v324_v36 }
 0x245   :  { %270 = vadd.xlane.f32.xlu1 %v269_v38 }
 0x2ce   :  { %v271_v7 = vpop.xlane.xlu1 %270 }
 0x2cf   :  { %327 = vlog2.f32 %v271_v7 }
 0x2dc   :  { %v328_v39 = vpop.eup %327 }
 0x2dd   :  { %v273_v40 = vmul.f32 0.6931472, %v328_v39 }
 0x2df   :  { %v274_v5 = vadd.f32 %v273_v40, %v262_v22 }
 0x2e1   :  { %v275_v41 = vsub.f32 %v274_v5, %v253_v18 }
 0x2e3   :  { %v277_v42 = vsel %vm276_vm6, %v275_v41, 0.0 }
 0x2e4   :  { %278 = vadd.xlane.f32.xlu1 %v277_v42 }
 0x36d   :  { %v279_v6 = vpop.xlane.xlu1 %278 }
 0x36e   :  { %v280_v43 = vrot.slane %v279_v6, 4 }
 0x370   :  { %v281_v44 = vadd.f32 %v280_v43, %v279_v6 }
 0x372   :  { %v282_v3 = vrot.slane %v281_v44, 2 }
 0x374   :  { %v283_v45 = vadd.f32 %v282_v3, %v281_v44 }
 0x376   :  { %v284_v46 = vrot.slane %v283_v45, 1 }
 0x378   :  { %v285_v4 = vadd.f32 %v284_v46, %v283_v45 }
 0x37a   :  { %306 = vpush %v285_v4 }
 0x3ab   :  { %s307_s2 = spop %306 }
 0x3ac   :  { %s287_s21 = smul.f32 0.125, %s307_s2 }
 0x3ae   :  { %289 = sst [smem:[#allocation5]] %s287_s21 }
 0x3af   :  { %297 = dma.smem_to_hbm %s366_s22, 16, %s506_s3, [#allocation4]  }
 0x3b0   :  { %359 = dma.done.wait [#allocation4], 16  }
 0x3b1   :  { %360 = vsyncadd [#allocation4], 4294967280 }
 0x3b2   :  { %301 = sfence }
 0x3b3   :  { %302 = vsyncpa [#allocation3], 1 }
 0x3b4   :  { %303 = vsyncpa [#allocation4], 1 }

</bundles_post_ra>
